<compile_context>
chip_gen: v5e
topology: v5e:2x2
jax: 0.10.0
libtpu: 0.0.40
codegen_flags: <defaults>
</compile_context>

<pallas_src>
import functools

import jax
import jax.numpy as jnp
from jax import lax
from jax.experimental import pallas as pl
from jax.experimental.pallas import tpu as pltpu

LEAKY_SLOPE = 0.2
BN_EPS = 1e-5


# ----------------------------------------------------------------------------- kernel
def _discriminator_kernel(x_ref, *refs, n_hidden, sigmoid):
    """Fused MLP forward on one batch tile.

    refs layout: for each hidden layer i: (W_i, b_i)  [BN already folded into W/b],
    then (w_out_row (1, fan_in), b_out (1, 1)), then the output ref (1, TM).
    """
    out_ref = refs[-1]

    h = x_ref[...]  # compute dtype (f32 or bf16); accumulation / elementwise stay f32
    for i in range(n_hidden):
        w = refs[2 * i][...]
        b = refs[2 * i + 1][...]
        # MXU matmul (bf16 or f32 inputs), f32 accumulation; bias + LeakyReLU in f32.
        h = jnp.dot(h.astype(w.dtype), w, preferred_element_type=jnp.float32) + b
        h = jnp.where(h > 0, h, LEAKY_SLOPE * h)
        # Dropout is identity in eval mode.
        # TODO(synk): training-mode dropout (stateful PRNG mask) not implemented.

    w_out = refs[2 * n_hidden][...]      # (1, fan_in), compute dtype
    b_out = refs[2 * n_hidden + 1][...]  # (1, 1) f32
    # Lane-dense output: contract w_out and h on their feature dims (N-T matmul on the MXU,
    # same pattern as q @ k^T) so the result is already a (1, TM) lane-major row.
    y = lax.dot_general(w_out, h.astype(w_out.dtype),
                        dimension_numbers=(((1,), (1,)), ((), ())),
                        preferred_element_type=jnp.float32)        # (1, TM)
    y = y + b_out
    if sigmoid:
        y = jax.nn.sigmoid(y)
    out_ref[...] = y.astype(out_ref.dtype)


# ----------------------------------------------------------------------------- params
def init_discriminator_params(key, in_features, layers):
    """Deterministic parameters mirroring the PyTorch module's shapes (eval mode)."""
    params = []
    fan_in = in_features
    for n in layers:
        key, kw, kb, kg, kbe, km, kv = jax.random.split(key, 7)
        w = jax.random.uniform(kw, (fan_in, n), jnp.float32, -0.1, 0.1)
        b = jax.random.uniform(kb, (1, n), jnp.float32, -0.1, 0.1)
        gamma = jax.random.uniform(kg, (1, n), jnp.float32, 0.5, 1.5)
        beta = jax.random.uniform(kbe, (1, n), jnp.float32, -0.1, 0.1)
        running_mean = jax.random.uniform(km, (1, n), jnp.float32, -0.5, 0.5)
        running_var = jax.random.uniform(kv, (1, n), jnp.float32, 0.5, 1.5)
        scale = gamma / jnp.sqrt(running_var + BN_EPS)  # eval-mode BN as affine
        shift = beta - running_mean * scale
        params.append((w, b, scale, shift))
        fan_in = n
    key, kw, kb = jax.random.split(key, 3)
    w_out = jax.random.uniform(kw, (fan_in, 1), jnp.float32, -0.1, 0.1)
    b_out = jax.random.uniform(kb, (1, 1), jnp.float32, -0.1, 0.1)
    return params, (w_out, b_out)


def _fold_params(hidden_params, out_params, compute_dtype):
    """Fold eval-mode BatchNorm into the Linear: W' = W*scale, b' = b*scale + shift.

    Note: with compute_dtype=bf16 the folded weights and streamed activations are quantized to
    bf16 (accumulation stays f32); callers needing bit-exact f32 should pass compute_dtype=f32.
    """
    folded = []
    for (w, b, scale, shift) in hidden_params:
        w_f = (w * scale).astype(compute_dtype)           # streamed/resident in compute dtype
        b_f = (b * scale + shift).astype(jnp.float32)      # bias stays f32
        folded.append((w_f, b_f))
    w_out, b_out = out_params
    w_out_row = jnp.reshape(w_out, (1, -1)).astype(compute_dtype)
    b_out2 = jnp.reshape(b_out, (1, 1)).astype(jnp.float32)
    return folded, (w_out_row, b_out2)


# ----------------------------------------------------------------------------- hw info / tiling
def _round_up(x, m):
    return ((x + m - 1) // m) * m


def _tpu_vmem_and_cores():
    """Best-effort per-TensorCore VMEM capacity and TensorCores-per-device."""
    vmem_cap = 64 << 20   # conservative default: v7x per-TC VMEM
    num_cores = 1
    try:
        info = pltpu.get_tpu_info()
        cap = getattr(info, "vmem_capacity_bytes", None)
        if cap:
            vmem_cap = int(cap)
        for name in ("num_cores", "num_tensorcores", "cores_per_chip", "core_count"):
            v = getattr(info, name, None)
            if isinstance(v, int) and v > 0:
                num_cores = max(num_cores, v)
    except Exception:
        pass
    try:
        dev = jax.devices()[0]
        kind = str(getattr(dev, "device_kind", "") or "")
        if "7" in kind:                      # v7x: 64 MiB per TC, 2 TCs per chip
            vmem_cap = min(vmem_cap, 64 << 20)
            num_cores = max(num_cores, 2)
        for name in ("num_cores", "core_count"):
            v = getattr(dev, name, None)
            if isinstance(v, int) and v > 0:
                num_cores = max(num_cores, v)
    except Exception:
        pass
    return vmem_cap, num_cores


def _per_row_bytes(in_features, widths, x_itemsize):
    """Conservative VMEM bytes per batch row: double-buffered x row, the two widest live f32
    activation rows, a bf16 recast of the widest one, and the (8, TM) f32 output tile (x2)."""
    w_pad = sorted((_round_up(w, 128) for w in widths), reverse=True)
    act_cols = w_pad[0] + (w_pad[1] if len(w_pad) > 1 else 0)
    return 2 * in_features * x_itemsize + 4 * act_cols + 2 * w_pad[0] + 2 * 8 * 4


def _select_tm(batch, in_features, widths, x_itemsize, param_bytes, vmem_budget,
               num_cores, row_align):
    """Largest batch tile fitting the scoped-VMEM budget (amortizes the ~0.35 us/grid-step cost),
    capped so very large batches still get multiple tiles (megacore split + DMA/compute overlap)."""
    per_row = _per_row_bytes(in_features, widths, x_itemsize)
    tm_full = _round_up(batch, row_align)

    avail = max(vmem_budget - 2 * param_bytes, per_row * row_align)
    tm_budget = max(avail // per_row, row_align)
    # keep each streamed x tile around <= 8 MiB so huge batches still pipeline
    tm_stream = max((8 << 20) // max(in_features * x_itemsize, 1), row_align)

    caps = [tm_budget, tm_stream]
    if tm_full >= 256:
        # >= 2 tiles (and >= num_cores tiles) once the batch is big enough
        caps.append(_round_up(-(-tm_full // max(2, num_cores)), 128))
    cap = max(min(caps), row_align)

    if cap >= tm_full:
        return tm_full                       # single tile covering the whole (aligned) batch
    return max((cap // 128) * 128, 128)      # multi-tile: lane/sublane-aligned tile


# ----------------------------------------------------------------------------- wrapper
def discriminator_forward(x, hidden_params, out_params, sigmoid=False,
                          compute_dtype=jnp.bfloat16):
    """x: (batch, in_features) -> (batch,) logits (or probs if sigmoid)."""
    batch, in_features = x.shape
    folded, (w_out_row, b_out) = _fold_params(hidden_params, out_params, compute_dtype)
    n_hidden = len(folded)

    param_arrays = []
    for (w, b) in folded:
        param_arrays += [w, b]
    param_arrays += [w_out_row, b_out]
    param_bytes = sum(int(a.size) * a.dtype.itemsize for a in param_arrays)

    widths = [in_features] + [w.shape[1] for (w, _) in folded]
    x_c = x.astype(compute_dtype)
    itemsize = jnp.dtype(compute_dtype).itemsize
    row_align = {4: 8, 2: 16, 1: 32}.get(itemsize, 8)   # sublane packing of the compute dtype

    vmem_cap, num_cores = _tpu_vmem_and_cores()
    budget = min(int(vmem_cap * 0.6), 96 << 20)          # ~38 MiB on v7x, ~77 MiB on v5e/v6e
    tm = _select_tm(batch, in_features, widths, itemsize, param_bytes, budget,
                    num_cores, row_align)

    num_tiles = (batch + tm - 1) // tm
    padded = num_tiles * tm
    if padded != batch:
        x_c = jnp.pad(x_c, ((0, padded - batch), (0, 0)))

    # x streams per grid step; params are full-block and stay VMEM-resident (constant index_map).
    x_spec = pl.BlockSpec((tm, in_features), lambda i: (i, 0))
    out_spec = pl.BlockSpec((1, tm), lambda i: (0, i))    # lane-dense output blocks
    param_specs = [pl.BlockSpec(a.shape, lambda i: (0, 0)) for a in param_arrays]

    need = 2 * param_bytes + _per_row_bytes(in_features, widths, itemsize) * tm
    vmem_limit = int(min(max(int(need * 1.25), 16 << 20), (vmem_cap * 3) // 4))

    kernel = functools.partial(_discriminator_kernel, n_hidden=n_hidden, sigmoid=sigmoid)
    out = pl.pallas_call(
        kernel,
        out_shape=jax.ShapeDtypeStruct((1, padded), jnp.float32),
        grid=(num_tiles,),
        in_specs=[x_spec] + param_specs,
        out_specs=out_spec,
        compiler_params=pltpu.CompilerParams(
            dimension_semantics=("parallel",),   # batch tiles shard across TCs on multi-core chips
            vmem_limit_bytes=vmem_limit,
        ),
    )(x_c, *param_arrays)

    # matches PyTorch's `x.reshape(-1)` (drop batch padding)
    return out.reshape(-1)[:batch]


# ----------------------------------------------------------------------------- reference
def _reference_forward(x, hidden_params, out_params, sigmoid=False):
    h = x.astype(jnp.float32)
    for (w, b, scale, shift) in hidden_params:
        h = h @ w + b
        h = h * scale + shift
        h = jnp.where(h > 0, h, LEAKY_SLOPE * h)
    y = h @ out_params[0] + out_params[1]
    if sigmoid:
        y = jax.nn.sigmoid(y)
    return y.reshape(-1)


if __name__ == "__main__":
    key = jax.random.PRNGKey(0)

    # ---- small case matching the module defaults: Discriminator(layers=[32, 32]) ----
    key, kx, kp = jax.random.split(key, 3)
    batch, in_features, layers = 8, 16, [32, 32]
    x = jax.random.normal(kx, (batch, in_features), jnp.float32)
    hidden_params, out_params = init_discriminator_params(kp, in_features, layers)

    logits = discriminator_forward(x, hidden_params, out_params, sigmoid=False,
                                   compute_dtype=jnp.float32)
    probs = discriminator_forward(x, hidden_params, out_params, sigmoid=True,
                                  compute_dtype=jnp.float32)
    jax.block_until_ready(logits)
    jax.block_until_ready(probs)

    ref_logits = _reference_forward(x, hidden_params, out_params, sigmoid=False)
    ref_probs = _reference_forward(x, hidden_params, out_params, sigmoid=True)
    assert logits.shape == (batch,)
    assert jnp.allclose(logits, ref_logits, atol=1e-4, rtol=1e-4)
    assert jnp.allclose(probs, ref_probs, atol=1e-4, rtol=1e-4)

    # default path: bf16 streaming (f32 accumulation) -> quantization-level tolerance
    logits_bf16 = discriminator_forward(x, hidden_params, out_params, sigmoid=False)
    jax.block_until_ready(logits_bf16)
    assert jnp.allclose(logits_bf16, ref_logits, atol=5e-2, rtol=5e-2)

    # ---- larger case exercising multiple batch tiles + padding ----
    key, kx2, kp2 = jax.random.split(key, 3)
    batch2, in_features2, layers2 = 1040, 64, [96, 64]
    x2 = jax.random.normal(kx2, (batch2, in_features2), jnp.float32)
    hp2, op2 = init_discriminator_params(kp2, in_features2, layers2)

    probs2 = discriminator_forward(x2, hp2, op2, sigmoid=True, compute_dtype=jnp.float32)
    jax.block_until_ready(probs2)
    ref2 = _reference_forward(x2, hp2, op2, sigmoid=True)
    assert probs2.shape == (batch2,)
    assert jnp.allclose(probs2, ref2, atol=1e-4, rtol=1e-4)

    probs2_bf16 = discriminator_forward(x2, hp2, op2, sigmoid=True)
    jax.block_until_ready(probs2_bf16)
    assert jnp.allclose(probs2_bf16, ref2, atol=5e-2, rtol=5e-2)

    print("KERNEL_OK")
</pallas_src>

<mosaic_0001>
module attributes {stable_mosaic.version = 11 : i64} {
  func.func @_discriminator_kernel(%arg0: i32, %arg1: memref<8x16xf32, #tpu.memory_space<vmem>>, %arg2: memref<16x32xf32, #tpu.memory_space<vmem>>, %arg3: memref<1x32xf32, #tpu.memory_space<vmem>>, %arg4: memref<32x32xf32, #tpu.memory_space<vmem>>, %arg5: memref<1x32xf32, #tpu.memory_space<vmem>>, %arg6: memref<1x32xf32, #tpu.memory_space<vmem>>, %arg7: memref<1x1xf32, #tpu.memory_space<vmem>>, %arg8: memref<1x8xf32, #tpu.memory_space<vmem>>) attributes {dimension_semantics = [#tpu.dimension_semantics<parallel>], iteration_bounds = array<i64: 1>, scalar_prefetch = 0 : i64, scratch_operands = 0 : i64, tpu.core_type = #tpu.core_type<tc>, window_params = [{transform_indices = @transform_0, window_bounds = array<i64: 8, 16>}, {pipeline_mode = #tpu.pipeline_mode<synchronous>, transform_indices = @transform_1, window_bounds = array<i64: 16, 32>}, {pipeline_mode = #tpu.pipeline_mode<synchronous>, transform_indices = @transform_2, window_bounds = array<i64: 1, 32>}, {pipeline_mode = #tpu.pipeline_mode<synchronous>, transform_indices = @transform_3, window_bounds = array<i64: 32, 32>}, {pipeline_mode = #tpu.pipeline_mode<synchronous>, transform_indices = @transform_4, window_bounds = array<i64: 1, 32>}, {pipeline_mode = #tpu.pipeline_mode<synchronous>, transform_indices = @transform_5, window_bounds = array<i64: 1, 32>}, {pipeline_mode = #tpu.pipeline_mode<synchronous>, transform_indices = @transform_6, window_bounds = array<i64: 1, 1>}, {transform_indices = @transform_7, window_bounds = array<i64: 1, 8>}]} {
    %c0 = arith.constant 0 : index
    %c0_0 = arith.constant 0 : index
    %0 = vector.load %arg1[%c0, %c0_0] : memref<8x16xf32, #tpu.memory_space<vmem>>, vector<8x16xf32>
    %c0_1 = arith.constant 0 : index
    %c0_2 = arith.constant 0 : index
    %1 = vector.load %arg2[%c0_1, %c0_2] : memref<16x32xf32, #tpu.memory_space<vmem>>, vector<16x32xf32>
    %c0_3 = arith.constant 0 : index
    %c0_4 = arith.constant 0 : index
    %2 = vector.load %arg3[%c0_3, %c0_4] : memref<1x32xf32, #tpu.memory_space<vmem>>, vector<1x32xf32>
    %cst = arith.constant dense<0.000000e+00> : vector<8x32xf32>
    %3 = tpu.matmul %0, %1, %cst {dimension_numbers = #tpu.dot_dimension_numbers<[1], [0], [0], [1], [0, 0, 1, 1], [], []>} : vector<8x16xf32>, vector<16x32xf32>, vector<8x32xf32> -> vector<8x32xf32>
    %4 = vector.broadcast %2 : vector<1x32xf32> to vector<8x32xf32>
    %5 = arith.addf %3, %4 : vector<8x32xf32>
    %cst_5 = arith.constant 0.000000e+00 : f32
    %6 = vector.broadcast %cst_5 : f32 to vector<8x32xf32>
    %7 = arith.cmpf ogt, %5, %6 : vector<8x32xf32>
    %cst_6 = arith.constant 2.000000e-01 : f32
    %8 = vector.broadcast %cst_6 : f32 to vector<8x32xf32>
    %9 = arith.mulf %8, %5 : vector<8x32xf32>
    %10 = arith.select %7, %5, %9 : vector<8x32xi1>, vector<8x32xf32>
    %c0_7 = arith.constant 0 : index
    %c0_8 = arith.constant 0 : index
    %11 = vector.load %arg4[%c0_7, %c0_8] : memref<32x32xf32, #tpu.memory_space<vmem>>, vector<32x32xf32>
    %c0_9 = arith.constant 0 : index
    %c0_10 = arith.constant 0 : index
    %12 = vector.load %arg5[%c0_9, %c0_10] : memref<1x32xf32, #tpu.memory_space<vmem>>, vector<1x32xf32>
    %cst_11 = arith.constant dense<0.000000e+00> : vector<8x32xf32>
    %13 = tpu.matmul %10, %11, %cst_11 {dimension_numbers = #tpu.dot_dimension_numbers<[1], [0], [0], [1], [0, 0, 1, 1], [], []>} : vector<8x32xf32>, vector<32x32xf32>, vector<8x32xf32> -> vector<8x32xf32>
    %14 = vector.broadcast %12 : vector<1x32xf32> to vector<8x32xf32>
    %15 = arith.addf %13, %14 : vector<8x32xf32>
    %cst_12 = arith.constant 0.000000e+00 : f32
    %16 = vector.broadcast %cst_12 : f32 to vector<8x32xf32>
    %17 = arith.cmpf ogt, %15, %16 : vector<8x32xf32>
    %cst_13 = arith.constant 2.000000e-01 : f32
    %18 = vector.broadcast %cst_13 : f32 to vector<8x32xf32>
    %19 = arith.mulf %18, %15 : vector<8x32xf32>
    %20 = arith.select %17, %15, %19 : vector<8x32xi1>, vector<8x32xf32>
    %c0_14 = arith.constant 0 : index
    %c0_15 = arith.constant 0 : index
    %21 = vector.load %arg6[%c0_14, %c0_15] : memref<1x32xf32, #tpu.memory_space<vmem>>, vector<1x32xf32>
    %c0_16 = arith.constant 0 : index
    %c0_17 = arith.constant 0 : index
    %22 = vector.load %arg7[%c0_16, %c0_17] : memref<1x1xf32, #tpu.memory_space<vmem>>, vector<1x1xf32>
    %cst_18 = arith.constant dense<0.000000e+00> : vector<1x8xf32>
    %23 = tpu.matmul %21, %20, %cst_18 {dimension_numbers = #tpu.dot_dimension_numbers<[1], [1], [0], [0], [0, 0, 1, 0], [], []>} : vector<1x32xf32>, vector<8x32xf32>, vector<1x8xf32> -> vector<1x8xf32>
    %24 = vector.broadcast %22 : vector<1x1xf32> to vector<1x8xf32>
    %25 = arith.addf %23, %24 : vector<1x8xf32>
    %c0_19 = arith.constant 0 : index
    %c0_20 = arith.constant 0 : index
    %26 = vector.load %arg8[%c0_19, %c0_20] : memref<1x8xf32, #tpu.memory_space<vmem>>, vector<1x8xf32>
    tpu.vector_store %arg8[%c0_19, %c0_20], %25 {strides = array<i32>} : memref<1x8xf32, #tpu.memory_space<vmem>>, vector<1x8xf32>,
    return
  }
  func.func @transform_0(%arg0: i32) -> (i32, i32) {
    %c0_i32 = arith.constant 0 : i32
    %c0_i32_0 = arith.constant 0 : i32
    return %arg0, %c0_i32 : i32, i32
  }
  func.func @transform_1(%arg0: i32) -> (i32, i32) {
    %c0_i32 = arith.constant 0 : i32
    %c0_i32_0 = arith.constant 0 : i32
    %c0_i32_1 = arith.constant 0 : i32
    return %c0_i32, %c0_i32_0 : i32, i32
  }
  func.func @transform_2(%arg0: i32) -> (i32, i32) {
    %c0_i32 = arith.constant 0 : i32
    %c0_i32_0 = arith.constant 0 : i32
    %c0_i32_1 = arith.constant 0 : i32
    return %c0_i32, %c0_i32_0 : i32, i32
  }
  func.func @transform_3(%arg0: i32) -> (i32, i32) {
    %c0_i32 = arith.constant 0 : i32
    %c0_i32_0 = arith.constant 0 : i32
    %c0_i32_1 = arith.constant 0 : i32
    return %c0_i32, %c0_i32_0 : i32, i32
  }
  func.func @transform_4(%arg0: i32) -> (i32, i32) {
    %c0_i32 = arith.constant 0 : i32
    %c0_i32_0 = arith.constant 0 : i32
    %c0_i32_1 = arith.constant 0 : i32
    return %c0_i32, %c0_i32_0 : i32, i32
  }
  func.func @transform_5(%arg0: i32) -> (i32, i32) {
    %c0_i32 = arith.constant 0 : i32
    %c0_i32_0 = arith.constant 0 : i32
    %c0_i32_1 = arith.constant 0 : i32
    return %c0_i32, %c0_i32_0 : i32, i32
  }
  func.func @transform_6(%arg0: i32) -> (i32, i32) {
    %c0_i32 = arith.constant 0 : i32
    %c0_i32_0 = arith.constant 0 : i32
    %c0_i32_1 = arith.constant 0 : i32
    return %c0_i32, %c0_i32_0 : i32, i32
  }
  func.func @transform_7(%arg0: i32) -> (i32, i32) {
    %c0_i32 = arith.constant 0 : i32
    %c0_i32_0 = arith.constant 0 : i32
    return %c0_i32, %arg0 : i32, i32
  }
}

</mosaic_0001>

<bundles_post_ra>
// kernel: tpu_custom_call.1
= control target key start
LH: loop header
LB: loop body
LE: loop exit
PB: predicated region body
PF: predicated region fallthrough
CT: control target
= control target key end

     0   :  { %s384_s0 = inlined_call_operand.hbm [shape: f32[8,16], index: 0, kind: input, shape index: {}]   ;;  %s385_s1 = inlined_call_operand.hbm [shape: f32[16,32], index: 1, kind: input, shape index: {}]   ;;  %s386_s2 = inlined_call_operand.vmem [shape: f32[1,32], index: 2, kind: input, shape index: {}]   ;;  %s387_s3 = inlined_call_operand.hbm [shape: f32[32,32], index: 3, kind: input, shape index: {}]   ;;  %s388_s4 = inlined_call_operand.vmem [shape: f32[1,32], index: 4, kind: input, shape index: {}]   ;;  %s389_s5 = inlined_call_operand.vmem [shape: f32[1,32], index: 5, kind: input, shape index: {}]   ;;  %s390_s6 = inlined_call_operand.<no memory space> [shape: f32[1,1], index: 6, kind: input, shape index: {}]   ;;  %s391_s7 = inlined_call_operand.hbm [shape: f32[1,8], index: 7, kind: output, shape index: {}]  }
   0x1   :  { %v12_v0 = vstv %s390_s6 }
   0x2   :  { %13 = vst [vmem:[#allocation2] sm:$0x1] %v12_v0 }
   0x3   :  { %14 = vsyncpa [#allocation4], 0 }
   0x4   :  { %15 = vsyncpa [#allocation7], 0  ;;  %s32_s28 = sshll.u32 %s385_s1, 4  ;;  %s33_s28 = int_to_ptr.hbm [resolvable:$true] %s32_s28 }
   0x5   :  { %16 = vsyncpa [#allocation5], 0  ;;  %s313_s29 = smov [#allocation6]   ;;  %s22_s10 = sshll.u32 %s384_s0, 4  ;;  %s23_s10 = int_to_ptr.hbm [resolvable:$true] %s22_s10 }
   0x6   :  { %s34_s30 = sshll.u32 %s313_s29, 4  ;;  %s314_s11 = smov 128   ;;  %s35_s30 = int_to_ptr.vmem [resolvable:$true] %s34_s30 }
   0x7   :  { %s315_s12 = smov 8   ;;  %s316_s6 = smov [#allocation3]  }
   0x8   :  { %40 = dma.hbm_to_vmem [thread:$0]  %s33_s28, 256, %s35_s30, [#allocation7], %s314_s11, %s314_s11, %s315_s12  }
   0x9   :  { %s24_s13 = sshll.u32 %s316_s6, 4  ;;  %s47_s16 = sshll.u32 %s387_s3, 4  ;;  %s25_s13 = int_to_ptr.vmem [resolvable:$true] %s24_s13  ;;  %s48_s16 = int_to_ptr.hbm [resolvable:$true] %s47_s16 }
   0xa   :  { %27 = dma.hbm_to_vmem [thread:$0]  %s23_s10, 128, %s25_s13, [#allocation4]  }
   0xb   :  { %s317_s1 = smov [#allocation8]  }
   0xc   :  { %s49_s17 = sshll.u32 %s317_s1, 4  ;;  %s50_s17 = int_to_ptr.vmem [resolvable:$true] %s49_s17 }
   0xd   :  { %55 = dma.hbm_to_vmem [thread:$0]  %s48_s16, 512, %s50_s17, [#allocation7], %s314_s11, %s314_s11, %s315_s12  }
   0xe   :  { %307 = dma.done.wait [#allocation4], 128  }
   0xf   :  { %308 = vsyncadd [#allocation4], 4294967168 }
  0x10   :  { %309 = dma.done.wait [#allocation7], 768  }
  0x11   :  { %310 = vsyncadd [#allocation7], 4294966528  ;;  %v76_v1 = vld [vmem:[#allocation6 + $0x8] sm:$0xff]  ;;  %v75_v2 = vld [vmem:[#allocation6] sm:$0xff]  ;;  %vm81_vm0 = vcmask 130048   ;;  %vm116_vm2 = vcmask 261120  }
  0x12   :  { %99 = vmatpush.msra.mxu0 %v76_v1  ;;  %v74_v3 = vld [vmem:[#allocation3] sm:$0xff]  ;;  %v111_v4 = vld [vmem:[#allocation8 + $0x18] sm:$0xff]  ;;  %v110_v5 = vld [vmem:[#allocation8 + $0x10] sm:$0xff]  ;;  %v318_v14 = vmov 0   ;;  %s319_s21 = smov [#allocation9]   ;;  %s186_s25 = sshll.u32 %s391_s7, 4  ;;  %s187_s25 = int_to_ptr.hbm [resolvable:$true] %s186_s25 }
  0x13   :  { %132 = vmatpush.msra.mxu1 %v111_v4  ;;  %v109_v6 = vld [vmem:[#allocation8 + $0x8] sm:$0xff]  ;;  %v108_v7 = vld [vmem:[#allocation8] sm:$0xff]  ;;  %208 = vset.pattern.permute.xlu0 %v318_v14  ;;  %s184_s22 = sshll.u32 %s319_s21, 4  ;;  %vm177_vm4 = vcmask 57344   ;;  %s185_s22 = int_to_ptr.vmem [resolvable:$true] %s184_s22 }
  0x14   :  { %100 = vmatpush.msra.mxu0 %v75_v2  ;;  %v209_v8 = vld [vmem:[%s386_s2] ss:$0 sm:$0xff] }
  0x15   :  { %197 = vmatmul.msk.f32.vlgmr.msra.gmra.mxu0 %vm81_vm0, %v74_v3  ;;  %133 = vmatpush.msra.mxu1 %v110_v5  ;;  %v144_v13 = vld [vmem:[#allocation2] sm:$0x1] }
  0x16   :  { %147 = vperm.xlu0 %208, %v144_v13   ;;  %v210_v15 = vld [vmem:[%s388_s4] ss:$0 sm:$0xff] }
  0x17   :  { %134 = vmatpush.msra.mxu1 %v109_v6  ;;  %v143_v20 = vld [vmem:[%s389_s5] sm:$0x1] }
  0x19   :  { %135 = vmatpush.msra.mxu1 %v108_v7 }
  0x88   :  { %v148_v21 = vpop.permute.xlu0 %147 }
  0x89   :  { %v150_v22 = vperm.slane %v148_v21, 0 }
  0x92   :  { %v102_v9 = vpop.f32.mrf.mxu0 }
  0x93   :  { %v103_v10 = vadd.f32 %v209_v8, %v102_v9 }
  0x95   :  { %v106_v11 = vmul.f32 0.2, %v103_v10  ;;  %vm105_vm1 = vcmp.gt.f32.partialorder %v103_v10, 0.0 }
  0x97   :  { %v107_v12 = vsel %vm105_vm1, %v103_v10, %v106_v11 }
  0x98   :  { %198 = vmatmul.msk.f32.vlgmr.msra.gmra.mxu1 %vm116_vm2, %v107_v12 }
 0x115   :  { %v137_v16 = vpop.f32.mrf.mxu1 }
 0x116   :  { %v138_v17 = vadd.f32 %v210_v15, %v137_v16 }
 0x118   :  { %vm140_vm3 = vcmp.gt.f32.partialorder %v138_v17, 0.0  ;;  %v141_v18 = vmul.f32 0.2, %v138_v17 }
 0x11a   :  { %v142_v19 = vsel %vm140_vm3, %v138_v17, %v141_v18 }
 0x11b   :  { %199 = vmatpush.xpose.msk.msra.mxu2 %vm116_vm2, %v142_v19 }
 0x11e   :  { %200 = vmatmul.msk.f32.vlgmr.msra.gmra.mxu2 %vm116_vm2, %v143_v20 }
 0x1a1   :  { %v174_v23 = vpop.f32.mrf.mxu2 }
 0x1a2   :  { %v175_v24 = vadd.f32 %v174_v23, %v150_v22 }
 0x1a4   :  { %178 = vst.msk [vmem:[#allocation9] sm:$0x1] %vm177_vm4, %v175_v24 }
 0x1a5   :  { %189 = dma.vmem_to_hbm [thread:$0]  %s185_s22, 16, %s187_s25, [#allocation5]  }
 0x1a6   :  { %311 = dma.done.wait [#allocation5], 16  }
 0x1a7   :  { %312 = vsyncadd [#allocation5], 4294967280 }
 0x1a8   :  { %194 = vsyncpa [#allocation4], 1 }
 0x1a9   :  { %195 = vsyncpa [#allocation7], 1 }
 0x1aa   :  { %196 = vsyncpa [#allocation5], 1 }

</bundles_post_ra>
